<compile_context>
chip_gen: v7x
topology: tpu7x:2x2x1
jax: 0.10.0
libtpu: 0.0.40
codegen_flags: <defaults>
</compile_context>

<pallas_src>
import jax
import jax.numpy as jnp
from jax.experimental import pallas as pl
from jax.experimental.pallas import tpu as pltpu

FORGET_BIAS = 1.0
LANE = 128
SUBLANE = 8


def _round_up(n, m):
    return ((n + m - 1) // m) * m


# ----------------------------------------------------------------------------
# Kernels
# ----------------------------------------------------------------------------
def _skip_lstm_compute_kernel(
    x_ref, h_ref, c_ref, u_ref,          # activations (batch tile)
    wx_ref, wh_ref, b_ref,               # LSTM linear (gate-padded, bf16 weights)
    w2_ref, b2_ref,                      # hc->1 projection (row vector + SMEM scalar)
    nh_ref, nc_ref, small_ref,           # outputs: new_h, new_c, packed (B,128) slab
):
    hcp = h_ref.shape[1]                 # padded hidden size (multiple of 128)

    x = x_ref[...]
    h = h_ref[...]
    c = c_ref[...]
    u = u_ref[...]

    # out = Linear(cat([x, h], 1))  ==  x @ Wx + h @ Wh + b   (bf16 in, f32 acc)
    gates = (
        jnp.dot(x.astype(jnp.bfloat16), wx_ref[...],
                preferred_element_type=jnp.float32)
        + jnp.dot(h.astype(jnp.bfloat16), wh_ref[...],
                  preferred_element_type=jnp.float32)
        + b_ref[...]
    )

    # FORGET_BIAS already folded into b for the forget-gate columns.
    # Slices are 128-lane aligned (hcp % 128 == 0) -> zero-cost views.
    forget_gate = jax.nn.sigmoid(gates[:, 0 * hcp:1 * hcp])
    input_gate = jax.nn.sigmoid(gates[:, 1 * hcp:2 * hcp])
    output_gate = jax.nn.sigmoid(gates[:, 2 * hcp:3 * hcp])
    modulation = jnp.tanh(gates[:, 3 * hcp:4 * hcp])

    c_cell = c * forget_gate + modulation * input_gate
    h_cell = output_gate * jnp.tanh(c_cell)

    # STE binarization (forward = round)
    binarized_u = jnp.round(u)           # (tile_b, 1)

    new_h = h_cell * binarized_u
    new_c = c_cell * binarized_u

    # delta_u = sigmoid(Linear(new_c)) as a VPU multiply + XLU lane reduction
    # (avoids a one-column MXU matmul; bias is an SMEM scalar).
    delta_u = jax.nn.sigmoid(
        jnp.sum(new_c * w2_ref[...], axis=1, keepdims=True) + b2_ref[0]
    )
    new_u = delta_u * binarized_u

    # n_skips = ceil(0.5 / new_u) - 1, guarded divide (inf where new_u == 0,
    # matching torch semantics).
    nz = new_u != 0.0
    safe_u = jnp.where(nz, new_u, 1.0)
    n_skips = jnp.where(nz, jnp.ceil(0.5 / safe_u) - 1.0, jnp.inf)

    nh_ref[...] = new_h
    nc_ref[...] = new_c

    # Pack the four narrow outputs into one lane-dense slab (cols 0..3 used).
    col = jax.lax.broadcasted_iota(jnp.int32, small_ref.shape, 1)
    small_ref[...] = jnp.where(
        col == 0, binarized_u,
        jnp.where(col == 1, new_u,
                  jnp.where(col == 2, delta_u,
                            jnp.where(col == 3, n_skips, 0.0))))


def _skip_lstm_skip_kernel(
    u_ref, h_ref, c_ref, du_ref,         # inputs (batch tile)
    nh_ref, nc_ref, small_ref,           # outputs
):
    u = u_ref[...]
    delta_u = du_ref[...]

    binarized_u = jnp.round(u)
    keep = 1.0 - binarized_u

    nh_ref[...] = h_ref[...] * keep
    nc_ref[...] = c_ref[...] * keep

    new_u = jnp.clip(u + delta_u, 0.0, 1.0) * keep

    nz = new_u != 0.0
    safe_u = jnp.where(nz, new_u, 1.0)
    n_skips = jnp.where(nz, jnp.ceil(0.5 / safe_u) - 1.0, jnp.inf)

    col = jax.lax.broadcasted_iota(jnp.int32, small_ref.shape, 1)
    small_ref[...] = jnp.where(
        col == 0, binarized_u,
        jnp.where(col == 1, new_u,
                  jnp.where(col == 2, delta_u,
                            jnp.where(col == 3, n_skips, 0.0))))


# ----------------------------------------------------------------------------
# Parameter init (deterministic, mirrors the PyTorch __init__)
# ----------------------------------------------------------------------------
def init_params(key, ic, hc):
    k1, k2 = jax.random.split(key)

    # cell.linear: weight (4*hc, ic+hc), xavier_normal_; bias 0
    fan_in, fan_out = ic + hc, 4 * hc
    std = (2.0 / (fan_in + fan_out)) ** 0.5
    w_cell = jax.random.normal(k1, (4 * hc, ic + hc), jnp.float32) * std
    b_cell = jnp.zeros((4 * hc,), jnp.float32)

    # self.linear: weight (1, hc), xavier_normal_; bias filled with 1
    std2 = (2.0 / (hc + 1)) ** 0.5
    w_proj = jax.random.normal(k2, (1, hc), jnp.float32) * std2
    b_proj = jnp.ones((1,), jnp.float32)

    return {"w_cell": w_cell, "b_cell": b_cell, "w_proj": w_proj, "b_proj": b_proj}


# ----------------------------------------------------------------------------
# One-time weight preparation (hoisted out of the per-step call)
# ----------------------------------------------------------------------------
def prepare_params(params, ic, hc):
    """Transpose, split into x/h parts, pad each gate to a 128-lane tile,
    fold FORGET_BIAS into the forget-gate bias, cast matmul weights to bf16."""
    hc_pad = _round_up(hc, LANE)

    w_t = params["w_cell"].T                 # (ic+hc, 4*hc)
    wx = w_t[:ic, :]                         # (ic, 4*hc)
    wh = w_t[ic:, :]                         # (hc, 4*hc)

    def pad_gate_cols(m):                    # (rows, 4*hc) -> (rows, 4*hc_pad)
        rows = m.shape[0]
        out = jnp.zeros((rows, 4 * hc_pad), jnp.float32)
        for k in range(4):
            out = out.at[:, k * hc_pad:k * hc_pad + hc].set(
                m[:, k * hc:(k + 1) * hc])
        return out

    wx_p = pad_gate_cols(wx)                                    # (ic, 4*hc_pad)
    wh_p = jnp.zeros((hc_pad, 4 * hc_pad), jnp.float32)
    wh_p = wh_p.at[:hc, :].set(pad_gate_cols(wh))               # (hc_pad, 4*hc_pad)
    b_p = pad_gate_cols(params["b_cell"].reshape(1, 4 * hc))    # (1, 4*hc_pad)
    b_p = b_p.at[0, 0:hc].add(FORGET_BIAS)                      # fold forget bias

    w2 = jnp.zeros((1, hc_pad), jnp.float32).at[0, :hc].set(params["w_proj"][0])
    b2 = params["b_proj"].reshape(1).astype(jnp.float32)        # SMEM scalar

    return {
        "wx": wx_p.astype(jnp.bfloat16),
        "wh": wh_p.astype(jnp.bfloat16),
        "b": b_p,
        "w2": w2,
        "b2": b2,
        "ic": ic,
        "hc": hc,
        "hc_pad": hc_pad,
    }


# ----------------------------------------------------------------------------
# Wrapper
# ----------------------------------------------------------------------------
def skip_lstm_cell_basic(prep, x, u, h, c, skip=False, delta_u=None):
    B = x.shape[0]
    ic, hc, hc_pad = prep["ic"], prep["hc"], prep["hc_pad"]

    # Batch tiling: sublane-aligned tile, "parallel" grid axis (megacore on v7x).
    # Keep the per-step activation footprint modest so double-buffered inputs,
    # the f32 gate slab and the resident weights all fit well under VMEM.
    bytes_per_row = 4 * (ic + 3 * hc_pad + 4 * hc_pad + LANE + 2)
    cap = max(SUBLANE, min(512, (8 * 1024 * 1024) // max(bytes_per_row, 1)))
    cap = (cap // SUBLANE) * SUBLANE
    tile_b = min(_round_up(B, SUBLANE), cap)
    b_pad = _round_up(B, tile_b)
    grid = (b_pad // tile_b,)

    def pad_batch(a):
        if a.shape[0] == b_pad:
            return a
        return jnp.zeros((b_pad,) + a.shape[1:], a.dtype).at[:a.shape[0]].set(a)

    def pad_hidden(a):
        if hc_pad == hc:
            return a
        return jnp.zeros((a.shape[0], hc_pad), a.dtype).at[:, :hc].set(a)

    x_p = pad_batch(x)
    h_p = pad_batch(pad_hidden(h))
    c_p = pad_batch(pad_hidden(c))
    u_p = pad_batch(u)

    def act_spec(width):
        return pl.BlockSpec((tile_b, width), lambda i: (i, 0))

    def resident_spec(shape):
        # Same block every grid step -> stays resident in VMEM across the grid.
        return pl.BlockSpec(shape, lambda i: (0, 0))

    smem_spec = pl.BlockSpec(memory_space=pltpu.MemorySpace.SMEM)

    out_shapes = (
        jax.ShapeDtypeStruct((b_pad, hc_pad), jnp.float32),   # new_h (padded)
        jax.ShapeDtypeStruct((b_pad, hc_pad), jnp.float32),   # new_c (padded)
        jax.ShapeDtypeStruct((b_pad, LANE), jnp.float32),     # packed slab
    )
    out_specs = (act_spec(hc_pad), act_spec(hc_pad), act_spec(LANE))

    cparams = pltpu.CompilerParams(
        dimension_semantics=("parallel",),
        vmem_limit_bytes=48 * 1024 * 1024,   # headroom under v7x's 64 MiB VMEM
    )

    if skip:
        assert delta_u is not None
        du_p = pad_batch(delta_u)
        nh, nc, slab = pl.pallas_call(
            _skip_lstm_skip_kernel,
            out_shape=out_shapes,
            grid=grid,
            in_specs=[act_spec(1), act_spec(hc_pad), act_spec(hc_pad), act_spec(1)],
            out_specs=out_specs,
            compiler_params=cparams,
        )(u_p, h_p, c_p, du_p)
        du_out = delta_u                      # returned unchanged (no VMEM copy)
    else:
        nh, nc, slab = pl.pallas_call(
            _skip_lstm_compute_kernel,
            out_shape=out_shapes,
            grid=grid,
            in_specs=[
                act_spec(ic), act_spec(hc_pad), act_spec(hc_pad), act_spec(1),
                resident_spec((ic, 4 * hc_pad)),
                resident_spec((hc_pad, 4 * hc_pad)),
                resident_spec((1, 4 * hc_pad)),
                resident_spec((1, hc_pad)),
                smem_spec,
            ],
            out_specs=out_specs,
            compiler_params=cparams,
        )(x_p, h_p, c_p, u_p, prep["wx"], prep["wh"], prep["b"],
          prep["w2"], prep["b2"])
        du_out = slab[:B, 2:3]

    binarized_u = slab[:B, 0:1]
    new_u = slab[:B, 1:2]
    n_skips = slab[:B, 3:4]
    return binarized_u, new_u, (nh[:B, :hc], nc[:B, :hc]), du_out, n_skips


# ----------------------------------------------------------------------------
# Pure-JAX fp32 reference (mirrors the PyTorch module exactly)
# ----------------------------------------------------------------------------
def reference(params, x, u, h, c, skip=False, delta_u=None):
    bu = jnp.round(u)
    if skip:
        keep = 1.0 - bu
        nh, nc = h * keep, c * keep
        nu = jnp.clip(u + delta_u, 0.0, 1.0) * keep
        du = delta_u
    else:
        cat = jnp.concatenate([x, h], axis=1)
        out = cat @ params["w_cell"].T + params["b_cell"]
        hc = h.shape[1]
        f = jax.nn.sigmoid(out[:, 0:hc] + FORGET_BIAS)
        i = jax.nn.sigmoid(out[:, hc:2 * hc])
        o = jax.nn.sigmoid(out[:, 2 * hc:3 * hc])
        g = jnp.tanh(out[:, 3 * hc:4 * hc])
        c_new = c * f + g * i
        h_new = o * jnp.tanh(c_new)
        nh, nc = h_new * bu, c_new * bu
        du = jax.nn.sigmoid(nc @ params["w_proj"].T + params["b_proj"])
        nu = du * bu
    ns = jnp.ceil(0.5 / nu) - 1.0
    return bu, nu, (nh, nc), du, ns


def _nskips_from_nu(nu):
    nz = nu != 0.0
    return jnp.where(nz, jnp.ceil(0.5 / jnp.where(nz, nu, 1.0)) - 1.0, jnp.inf)


if __name__ == "__main__":
    B, IC, HC = 2, 4, 32
    key = jax.random.PRNGKey(0)
    kp, kx, kh, kc, ku = jax.random.split(key, 5)

    params = init_params(kp, IC, HC)
    prep = prepare_params(params, IC, HC)

    x = jax.random.normal(kx, (B, IC), jnp.float32)
    h = jax.random.normal(kh, (B, HC), jnp.float32)
    c = jax.random.normal(kc, (B, HC), jnp.float32)
    u = jax.random.uniform(ku, (B, 1), jnp.float32)

    # --- skip=False (LSTM gates + projection, one Pallas kernel) ---
    bu, nu, (nh, nc), du, ns = skip_lstm_cell_basic(prep, x, u, h, c, skip=False)
    jax.block_until_ready((bu, nu, nh, nc, du, ns))

    rbu, rnu, (rnh, rnc), rdu, rns = reference(params, x, u, h, c, skip=False)
    # binarization is exact
    assert bool(jnp.array_equal(bu, rbu))
    # gate matmul runs in bf16 (fp32 accumulate) -> loose tolerance vs fp32 ref
    assert jnp.allclose(nh, rnh, atol=5e-2, rtol=5e-2)
    assert jnp.allclose(nc, rnc, atol=5e-2, rtol=5e-2)
    assert jnp.allclose(du, rdu, atol=5e-2, rtol=5e-2)
    assert jnp.allclose(nu, rnu, atol=5e-2, rtol=5e-2)
    # n_skips self-consistent with the kernel's own new_u (inf where new_u == 0)
    assert jnp.allclose(ns, _nskips_from_nu(nu), equal_nan=True)

    # --- skip=True (pure elementwise kernel) ---
    bu2, nu2, (nh2, nc2), du2, ns2 = skip_lstm_cell_basic(
        prep, x, u, h, c, skip=True, delta_u=du
    )
    jax.block_until_ready((bu2, nu2, nh2, nc2, du2, ns2))

    rbu2, rnu2, (rnh2, rnc2), rdu2, rns2 = reference(
        params, x, u, h, c, skip=True, delta_u=du
    )
    assert bool(jnp.array_equal(bu2, rbu2))
    assert jnp.allclose(nh2, rnh2, atol=1e-5)
    assert jnp.allclose(nc2, rnc2, atol=1e-5)
    assert jnp.allclose(nu2, rnu2, atol=1e-5)
    assert jnp.allclose(ns2, _nskips_from_nu(nu2), equal_nan=True)

    print("KERNEL_OK")
</pallas_src>

<mosaic_0001>
module attributes {stable_mosaic.version = 11 : i64} {
  func.func @_skip_lstm_compute_kernel(%arg0: i32, %arg1: memref<8x4xf32, #tpu.memory_space<vmem>>, %arg2: memref<8x128xf32, #tpu.memory_space<vmem>>, %arg3: memref<8x128xf32, #tpu.memory_space<vmem>>, %arg4: memref<8x1xf32, #tpu.memory_space<vmem>>, %arg5: memref<4x512xbf16, #tpu.memory_space<vmem>>, %arg6: memref<128x512xbf16, #tpu.memory_space<vmem>>, %arg7: memref<1x512xf32, #tpu.memory_space<vmem>>, %arg8: memref<1x128xf32, #tpu.memory_space<vmem>>, %arg9: memref<1xf32, #tpu.memory_space<smem>>, %arg10: memref<8x128xf32, #tpu.memory_space<vmem>>, %arg11: memref<8x128xf32, #tpu.memory_space<vmem>>, %arg12: memref<8x128xf32, #tpu.memory_space<vmem>>) attributes {dimension_semantics = [#tpu.dimension_semantics<parallel>], iteration_bounds = array<i64: 1>, scalar_prefetch = 0 : i64, scratch_operands = 0 : i64, tpu.core_type = #tpu.core_type<tc>, window_params = [{transform_indices = @transform_0, window_bounds = array<i64: 8, 4>}, {transform_indices = @transform_1, window_bounds = array<i64: 8, 128>}, {transform_indices = @transform_2, window_bounds = array<i64: 8, 128>}, {transform_indices = @transform_3, window_bounds = array<i64: 8, 1>}, {pipeline_mode = #tpu.pipeline_mode<synchronous>, transform_indices = @transform_4, window_bounds = array<i64: 4, 512>}, {pipeline_mode = #tpu.pipeline_mode<synchronous>, transform_indices = @transform_5, window_bounds = array<i64: 128, 512>}, {pipeline_mode = #tpu.pipeline_mode<synchronous>, transform_indices = @transform_6, window_bounds = array<i64: 1, 512>}, {pipeline_mode = #tpu.pipeline_mode<synchronous>, transform_indices = @transform_7, window_bounds = array<i64: 1, 128>}, {transform_indices = @transform_8, window_bounds = array<i64: 1>}, {transform_indices = @transform_9, window_bounds = array<i64: 8, 128>}, {transform_indices = @transform_10, window_bounds = array<i64: 8, 128>}, {transform_indices = @transform_11, window_bounds = array<i64: 8, 128>}]} {
    %c0 = arith.constant 0 : index
    %c0_0 = arith.constant 0 : index
    %0 = vector.load %arg1[%c0, %c0_0] : memref<8x4xf32, #tpu.memory_space<vmem>>, vector<8x4xf32>
    %c0_1 = arith.constant 0 : index
    %c0_2 = arith.constant 0 : index
    %1 = vector.load %arg2[%c0_1, %c0_2] : memref<8x128xf32, #tpu.memory_space<vmem>>, vector<8x128xf32>
    %c0_3 = arith.constant 0 : index
    %c0_4 = arith.constant 0 : index
    %2 = vector.load %arg3[%c0_3, %c0_4] : memref<8x128xf32, #tpu.memory_space<vmem>>, vector<8x128xf32>
    %c0_5 = arith.constant 0 : index
    %c0_6 = arith.constant 0 : index
    %3 = vector.load %arg4[%c0_5, %c0_6] : memref<8x1xf32, #tpu.memory_space<vmem>>, vector<8x1xf32>
    %4 = arith.truncf %0 : vector<8x4xf32> to vector<8x4xbf16>
    %c0_7 = arith.constant 0 : index
    %c0_8 = arith.constant 0 : index
    %5 = vector.load %arg5[%c0_7, %c0_8] : memref<4x512xbf16, #tpu.memory_space<vmem>>, vector<4x512xbf16>
    %cst = arith.constant dense<0.000000e+00> : vector<8x512xf32>
    %6 = tpu.matmul %4, %5, %cst {dimension_numbers = #tpu.dot_dimension_numbers<[1], [0], [0], [1], [0, 0, 1, 1], [], []>} : vector<8x4xbf16>, vector<4x512xbf16>, vector<8x512xf32> -> vector<8x512xf32>
    %7 = arith.truncf %1 : vector<8x128xf32> to vector<8x128xbf16>
    %c0_9 = arith.constant 0 : index
    %c0_10 = arith.constant 0 : index
    %8 = vector.load %arg6[%c0_9, %c0_10] : memref<128x512xbf16, #tpu.memory_space<vmem>>, vector<128x512xbf16>
    %cst_11 = arith.constant dense<0.000000e+00> : vector<8x512xf32>
    %9 = tpu.matmul %7, %8, %cst_11 {dimension_numbers = #tpu.dot_dimension_numbers<[1], [0], [0], [1], [0, 0, 1, 1], [], []>} : vector<8x128xbf16>, vector<128x512xbf16>, vector<8x512xf32> -> vector<8x512xf32>
    %10 = arith.addf %6, %9 : vector<8x512xf32>
    %c0_12 = arith.constant 0 : index
    %c0_13 = arith.constant 0 : index
    %11 = vector.load %arg7[%c0_12, %c0_13] : memref<1x512xf32, #tpu.memory_space<vmem>>, vector<1x512xf32>
    %12 = vector.broadcast %11 : vector<1x512xf32> to vector<8x512xf32>
    %13 = arith.addf %10, %12 : vector<8x512xf32>
    %14 = vector.extract_strided_slice %13 {offsets = [0, 0], sizes = [8, 128], strides = [1, 1]} : vector<8x512xf32> to vector<8x128xf32>
    %15 = arith.negf %14 : vector<8x128xf32>
    %16 = math.exp %15 : vector<8x128xf32>
    %cst_14 = arith.constant 1.000000e+00 : f32
    %17 = vector.broadcast %cst_14 : f32 to vector<8x128xf32>
    %18 = arith.addf %17, %16 : vector<8x128xf32>
    %19 = arith.divf %17, %18 : vector<8x128xf32>
    %20 = vector.extract_strided_slice %13 {offsets = [0, 128], sizes = [8, 128], strides = [1, 1]} : vector<8x512xf32> to vector<8x128xf32>
    %21 = arith.negf %20 : vector<8x128xf32>
    %22 = math.exp %21 : vector<8x128xf32>
    %cst_15 = arith.constant 1.000000e+00 : f32
    %23 = vector.broadcast %cst_15 : f32 to vector<8x128xf32>
    %24 = arith.addf %23, %22 : vector<8x128xf32>
    %25 = arith.divf %23, %24 : vector<8x128xf32>
    %26 = vector.extract_strided_slice %13 {offsets = [0, 256], sizes = [8, 128], strides = [1, 1]} : vector<8x512xf32> to vector<8x128xf32>
    %27 = arith.negf %26 : vector<8x128xf32>
    %28 = math.exp %27 : vector<8x128xf32>
    %cst_16 = arith.constant 1.000000e+00 : f32
    %29 = vector.broadcast %cst_16 : f32 to vector<8x128xf32>
    %30 = arith.addf %29, %28 : vector<8x128xf32>
    %31 = arith.divf %29, %30 : vector<8x128xf32>
    %32 = vector.extract_strided_slice %13 {offsets = [0, 384], sizes = [8, 128], strides = [1, 1]} : vector<8x512xf32> to vector<8x128xf32>
    %33 = math.tanh %32 : vector<8x128xf32>
    %34 = arith.mulf %2, %19 : vector<8x128xf32>
    %35 = arith.mulf %33, %25 : vector<8x128xf32>
    %36 = arith.addf %34, %35 : vector<8x128xf32>
    %37 = math.tanh %36 : vector<8x128xf32>
    %38 = arith.mulf %31, %37 : vector<8x128xf32>
    %39 = math.roundeven %3 : vector<8x1xf32>
    %40 = vector.broadcast %39 : vector<8x1xf32> to vector<8x128xf32>
    %41 = arith.mulf %38, %40 : vector<8x128xf32>
    %42 = vector.broadcast %39 : vector<8x1xf32> to vector<8x128xf32>
    %43 = arith.mulf %36, %42 : vector<8x128xf32>
    %c0_17 = arith.constant 0 : index
    %c0_18 = arith.constant 0 : index
    %44 = vector.load %arg8[%c0_17, %c0_18] : memref<1x128xf32, #tpu.memory_space<vmem>>, vector<1x128xf32>
    %45 = vector.broadcast %44 : vector<1x128xf32> to vector<8x128xf32>
    %46 = arith.mulf %43, %45 : vector<8x128xf32>
    %cst_19 = arith.constant dense<0.000000e+00> : vector<8xf32>
    %47 = vector.multi_reduction <add>, %46, %cst_19 [1] : vector<8x128xf32> to vector<8xf32>
    %48 = vector.shape_cast %47 : vector<8xf32> to vector<8x1xf32>
    %c0_20 = arith.constant 0 : index
    %49 = memref.load %arg9[%c0_20] : memref<1xf32, #tpu.memory_space<smem>>
    %50 = vector.broadcast %49 : f32 to vector<8x1xf32>
    %51 = arith.addf %48, %50 : vector<8x1xf32>
    %52 = arith.negf %51 : vector<8x1xf32>
    %53 = math.exp %52 : vector<8x1xf32>
    %cst_21 = arith.constant 1.000000e+00 : f32
    %54 = vector.broadcast %cst_21 : f32 to vector<8x1xf32>
    %55 = arith.addf %54, %53 : vector<8x1xf32>
    %56 = arith.divf %54, %55 : vector<8x1xf32>
    %57 = arith.mulf %56, %39 : vector<8x1xf32>
    %cst_22 = arith.constant 0.000000e+00 : f32
    %58 = vector.broadcast %cst_22 : f32 to vector<8x1xf32>
    %59 = arith.cmpf one, %57, %58 : vector<8x1xf32>
    %cst_23 = arith.constant 1.000000e+00 : f32
    %60 = vector.broadcast %cst_23 : f32 to vector<8x1xf32>
    %61 = arith.select %59, %57, %60 : vector<8x1xi1>, vector<8x1xf32>
    %cst_24 = arith.constant 5.000000e-01 : f32
    %62 = vector.broadcast %cst_24 : f32 to vector<8x1xf32>
    %63 = arith.divf %62, %61 : vector<8x1xf32>
    %64 = math.ceil %63 : vector<8x1xf32>
    %cst_25 = arith.constant 1.000000e+00 : f32
    %65 = vector.broadcast %cst_25 : f32 to vector<8x1xf32>
    %66 = arith.subf %64, %65 : vector<8x1xf32>
    %cst_26 = arith.constant 0x7F800000 : f32
    %67 = vector.broadcast %cst_26 : f32 to vector<8x1xf32>
    %68 = arith.select %59, %66, %67 : vector<8x1xi1>, vector<8x1xf32>
    %c0_27 = arith.constant 0 : index
    %c0_28 = arith.constant 0 : index
    %69 = vector.load %arg10[%c0_27, %c0_28] : memref<8x128xf32, #tpu.memory_space<vmem>>, vector<8x128xf32>
    tpu.vector_store %arg10[%c0_27, %c0_28], %41 {strides = array<i32>} : memref<8x128xf32, #tpu.memory_space<vmem>>, vector<8x128xf32>,
    %c0_29 = arith.constant 0 : index
    %c0_30 = arith.constant 0 : index
    %70 = vector.load %arg11[%c0_29, %c0_30] : memref<8x128xf32, #tpu.memory_space<vmem>>, vector<8x128xf32>
    tpu.vector_store %arg11[%c0_29, %c0_30], %43 {strides = array<i32>} : memref<8x128xf32, #tpu.memory_space<vmem>>, vector<8x128xf32>,
    %71 = tpu.iota {dimensions = array<i32: 1>} : vector<8x128xi32>
    %c0_i32 = arith.constant 0 : i32
    %72 = vector.broadcast %c0_i32 : i32 to vector<8x128xi32>
    %73 = arith.cmpi eq, %71, %72 : vector<8x128xi32>
    %c1_i32 = arith.constant 1 : i32
    %74 = vector.broadcast %c1_i32 : i32 to vector<8x128xi32>
    %75 = arith.cmpi eq, %71, %74 : vector<8x128xi32>
    %c2_i32 = arith.constant 2 : i32
    %76 = vector.broadcast %c2_i32 : i32 to vector<8x128xi32>
    %77 = arith.cmpi eq, %71, %76 : vector<8x128xi32>
    %c3_i32 = arith.constant 3 : i32
    %78 = vector.broadcast %c3_i32 : i32 to vector<8x128xi32>
    %79 = arith.cmpi eq, %71, %78 : vector<8x128xi32>
    %cst_31 = arith.constant 0.000000e+00 : f32
    %80 = vector.shape_cast %68 : vector<8x1xf32> to vector<8x1xf32>
    %81 = vector.broadcast %80 : vector<8x1xf32> to vector<8x128xf32>
    %82 = vector.broadcast %cst_31 : f32 to vector<8x128xf32>
    %83 = arith.select %79, %81, %82 : vector<8x128xi1>, vector<8x128xf32>
    %84 = vector.shape_cast %56 : vector<8x1xf32> to vector<8x1xf32>
    %85 = vector.broadcast %84 : vector<8x1xf32> to vector<8x128xf32>
    %86 = arith.select %77, %85, %83 : vector<8x128xi1>, vector<8x128xf32>
    %87 = vector.shape_cast %57 : vector<8x1xf32> to vector<8x1xf32>
    %88 = vector.broadcast %87 : vector<8x1xf32> to vector<8x128xf32>
    %89 = arith.select %75, %88, %86 : vector<8x128xi1>, vector<8x128xf32>
    %90 = vector.shape_cast %39 : vector<8x1xf32> to vector<8x1xf32>
    %91 = vector.broadcast %90 : vector<8x1xf32> to vector<8x128xf32>
    %92 = arith.select %73, %91, %89 : vector<8x128xi1>, vector<8x128xf32>
    %c0_32 = arith.constant 0 : index
    %c0_33 = arith.constant 0 : index
    %93 = vector.load %arg12[%c0_32, %c0_33] : memref<8x128xf32, #tpu.memory_space<vmem>>, vector<8x128xf32>
    tpu.vector_store %arg12[%c0_32, %c0_33], %92 {strides = array<i32>} : memref<8x128xf32, #tpu.memory_space<vmem>>, vector<8x128xf32>,
    return
  }
  func.func @transform_0(%arg0: i32) -> (i32, i32) {
    %c0_i32 = arith.constant 0 : i32
    %c0_i32_0 = arith.constant 0 : i32
    return %arg0, %c0_i32 : i32, i32
  }
  func.func @transform_1(%arg0: i32) -> (i32, i32) {
    %c0_i32 = arith.constant 0 : i32
    %c0_i32_0 = arith.constant 0 : i32
    return %arg0, %c0_i32 : i32, i32
  }
  func.func @transform_2(%arg0: i32) -> (i32, i32) {
    %c0_i32 = arith.constant 0 : i32
    %c0_i32_0 = arith.constant 0 : i32
    return %arg0, %c0_i32 : i32, i32
  }
  func.func @transform_3(%arg0: i32) -> (i32, i32) {
    %c0_i32 = arith.constant 0 : i32
    %c0_i32_0 = arith.constant 0 : i32
    return %arg0, %c0_i32 : i32, i32
  }
  func.func @transform_4(%arg0: i32) -> (i32, i32) {
    %c0_i32 = arith.constant 0 : i32
    %c0_i32_0 = arith.constant 0 : i32
    %c0_i32_1 = arith.constant 0 : i32
    return %c0_i32, %c0_i32_0 : i32, i32
  }
  func.func @transform_5(%arg0: i32) -> (i32, i32) {
    %c0_i32 = arith.constant 0 : i32
    %c0_i32_0 = arith.constant 0 : i32
    %c0_i32_1 = arith.constant 0 : i32
    return %c0_i32, %c0_i32_0 : i32, i32
  }
  func.func @transform_6(%arg0: i32) -> (i32, i32) {
    %c0_i32 = arith.constant 0 : i32
    %c0_i32_0 = arith.constant 0 : i32
    %c0_i32_1 = arith.constant 0 : i32
    return %c0_i32, %c0_i32_0 : i32, i32
  }
  func.func @transform_7(%arg0: i32) -> (i32, i32) {
    %c0_i32 = arith.constant 0 : i32
    %c0_i32_0 = arith.constant 0 : i32
    %c0_i32_1 = arith.constant 0 : i32
    return %c0_i32, %c0_i32_0 : i32, i32
  }
  func.func @transform_8(%arg0: i32) -> i32 {
    %c0_i32 = arith.constant 0 : i32
    %c0_i32_0 = arith.constant 0 : i32
    return %c0_i32 : i32
  }
  func.func @transform_9(%arg0: i32) -> (i32, i32) {
    %c0_i32 = arith.constant 0 : i32
    %c0_i32_0 = arith.constant 0 : i32
    return %arg0, %c0_i32 : i32, i32
  }
  func.func @transform_10(%arg0: i32) -> (i32, i32) {
    %c0_i32 = arith.constant 0 : i32
    %c0_i32_0 = arith.constant 0 : i32
    return %arg0, %c0_i32 : i32, i32
  }
  func.func @transform_11(%arg0: i32) -> (i32, i32) {
    %c0_i32 = arith.constant 0 : i32
    %c0_i32_0 = arith.constant 0 : i32
    return %arg0, %c0_i32 : i32, i32
  }
}

</mosaic_0001>

<bundles_post_ra>
// kernel: tpu_custom_call.1
= control target key start
LH: loop header
LB: loop body
LE: loop exit
PB: predicated region body
PF: predicated region fallthrough
CT: control target
= control target key end

     0   :  { %18 = vsyncpa [#allocation4], 0  ;;  %s986_s0 = inlined_call_operand.vmem [shape: f32[8,4], index: 0, kind: input, shape index: {}]   ;;  %s987_s1 = inlined_call_operand.vmem [shape: f32[8,128], index: 1, kind: input, shape index: {}]   ;;  %s988_s2 = inlined_call_operand.vmem [shape: f32[8,128], index: 2, kind: input, shape index: {}]   ;;  %s989_s3 = inlined_call_operand.vmem [shape: f32[8,1], index: 3, kind: input, shape index: {}]   ;;  %s990_s4 = inlined_call_operand.vmem [shape: bf16[4,512], index: 4, kind: input, shape index: {}]   ;;  %s991_s5 = inlined_call_operand.hbm [shape: bf16[128,512], index: 5, kind: input, shape index: {}]   ;;  %s992_s6 = inlined_call_operand.vmem [shape: f32[1,512], index: 6, kind: input, shape index: {}]   ;;  %s993_s7 = inlined_call_operand.vmem [shape: f32[1,128], index: 7, kind: input, shape index: {}]   ;;  %s994_s8 = inlined_call_operand.<no memory space> [shape: f32[1], index: 8, kind: input, shape index: {}]   ;;  %s995_s9 = inlined_call_operand.hbm [shape: f32[8,128], index: 9, kind: output, shape index: {0}]   ;;  %s996_s10 = inlined_call_operand.hbm [shape: f32[8,128], index: 10, kind: output, shape index: {1}]   ;;  %s997_s11 = inlined_call_operand.hbm [shape: f32[8,128], index: 11, kind: output, shape index: {2}]  }
   0x1   :  { %19 = vsyncpa [#allocation5], 0 }
   0x2   :  { %20 = vsyncpa [#allocation8], 0  ;;  %s819_s17 = smov [#allocation3]   ;;  %s725_s21 = scalar_lea.hbm %s991_s5, 4096 }
   0x3   :  { %s36_s18 = sshll.u32 %s819_s17, 4  ;;  %p726_p0 = scmp.ne.s32.totalorder %s991_s5, %s725_s21  ;;  %s37_s18 = int_to_ptr.vmem [resolvable:$true] %s36_s18 }
   0x4   :  { %p729_p1 = scmp.lt.u32.totalorder %s725_s21, %s991_s5 }
   0x6   :  { %p731_p2 = pnand %p729_p1, %p726_p0 }
   0x8   :  { %734 = shalt.err (!%p731_p2)
}
   0x9   :  { %s735_s26 = scalar_lea.vmem %s37_s18, 4096  ;;  %p740_p4 = scmp.lt.s32.totalorder %s37_s18, %s37_s18 }
   0xa   :  { %p736_p3 = scmp.ne.s32.totalorder %s37_s18, %s735_s26  ;;  %p741_p5 = scmp.lt.s32.totalorder %s735_s26, %s735_s26 }
   0xc   :  { %p742_p6 = por %p741_p5, %p740_p4 }
   0xe   :  { %p743_p7 = pnand %p742_p6, %p736_p3 }
  0x10   :  { %746 = shalt.err (!%p743_p7)
}
  0x11   :  { %s820_s27 = smov 256   ;;  %s821_s28 = smov 16  }
  0x12   :  { %42 = dma.hbm_to_vmem [thread:$0]  %s991_s5, 4096, %s37_s18, [#allocation4], %s820_s27, %s820_s27, %s821_s28  }
  0x13   :  { %813 = dma.done.wait [#allocation4], 4096  }
  0x14   :  { %814 = vsyncadd [#allocation4], 4294963200  ;;  %v822_v0 = vmov 0   ;;  %v654_v1 = vld [vmem:[#allocation3 + $0x4] ss:$16 sps:$4 sm:$0xff]   ;;  %v339_v19 = vlaneseq  ;;  %vm356_vm0 = vcmask 1041408  }
  0x15   :  { %284 = vmatprep.mubr.bf16.mxu0 %v822_v0  ;;  %325 = vmatprep.mubr.bf16.mxu1 %v822_v0  ;;  %v656_v2 = vld [vmem:[#allocation3] ss:$16 sps:$4 sm:$0xff]   ;;  %v657_v3 = vld [vmem:[#allocation3 + $0x24] ss:$16 sps:$4 sm:$0xff]   ;;  %v660_v5 = vld [vmem:[#allocation3 + $0xc] ss:$16 sps:$4 sm:$0xff]  }
  0x16   :  { %652 = vset.pattern.permute.xlu0 %v822_v0  ;;  %653 = vset.pattern.permute.xlu1 %v822_v0  ;;  %v659_v4 = vld [vmem:[#allocation3 + $0x20] ss:$16 sps:$4 sm:$0xff]   ;;  %v662_v6 = vld [vmem:[#allocation3 + $0x44] ss:$16 sps:$4 sm:$0xff]   ;;  %v664_v7 = vld [vmem:[#allocation3 + $0x8] ss:$16 sps:$4 sm:$0xff]  }
  0x17   :  { %252 = vmatprep.subr.bf16.mxu0 %v654_v1  ;;  %293 = vmatprep.subr.bf16.mxu1 %v660_v5  ;;  %v666_v8 = vld [vmem:[#allocation3 + $0x2c] ss:$16 sps:$4 sm:$0xff]   ;;  %v665_v9 = vld [vmem:[#allocation3 + $0x40] ss:$16 sps:$4 sm:$0xff]   ;;  %v668_v10 = vld [vmem:[#allocation3 + $0x64] ss:$16 sps:$4 sm:$0xff]  }
  0x18   :  { %253 = vmatpush1.bf16.msra.mxu0 %v656_v2  ;;  %294 = vmatpush1.bf16.msra.mxu1 %v664_v7  ;;  %v670_v11 = vld [vmem:[#allocation3 + $0x28] ss:$16 sps:$4 sm:$0xff]   ;;  %v672_v12 = vld [vmem:[#allocation3 + $0x4c] ss:$16 sps:$4 sm:$0xff]   ;;  %v671_v13 = vld [vmem:[#allocation3 + $0x60] ss:$16 sps:$4 sm:$0xff]  }
  0x19   :  { %254 = vmatprep.subr.bf16.mxu0 %v657_v3  ;;  %295 = vmatprep.subr.bf16.mxu1 %v666_v8  ;;  %v676_v14 = vld [vmem:[#allocation3 + $0x48] ss:$16 sps:$4 sm:$0xff]   ;;  %v678_v15 = vld [vmem:[#allocation3 + $0x6c] ss:$16 sps:$4 sm:$0xff]   ;;  %v674_v16 = vld [vmem:[#allocation3 + $0x84] ss:$16 sps:$4 sm:$0xff]  }
  0x1a   :  { %v823_v17 = vmov 1983009808   ;;  %v682_v20 = vld [vmem:[#allocation3 + $0x68] ss:$16 sps:$4 sm:$0xff]   ;;  %v677_v21 = vld [vmem:[#allocation3 + $0x80] ss:$16 sps:$4 sm:$0xff]  }
  0x1b   :  { %v337_v18 = vunpack.c.l.s4 %v823_v17  ;;  %v684_v22 = vld [vmem:[#allocation3 + $0x8c] ss:$16 sps:$4 sm:$0xff]   ;;  %v680_v23 = vld [vmem:[#allocation3 + $0xa4] ss:$16 sps:$4 sm:$0xff]   ;;  %v904_v25 = vshrl.u32 %v339_v19, 7  ;;  %vm352_vm1 = vcmask 31744  }
  0x1c   :  { %255 = vmatpush1.bf16.msra.mxu0 %v659_v4  ;;  %296 = vmatpush1.bf16.msra.mxu1 %v670_v11  ;;  %v688_v26 = vld [vmem:[#allocation3 + $0x88] ss:$16 sps:$4 sm:$0xff]   ;;  %v683_v27 = vld [vmem:[#allocation3 + $0xa0] ss:$16 sps:$4 sm:$0xff]   ;;  %v690_v28 = vld [vmem:[#allocation3 + $0xac] ss:$16 sps:$4 sm:$0xff]  }
  0x1d   :  { %256 = vmatprep.subr.bf16.mxu0 %v662_v6  ;;  %297 = vmatprep.subr.bf16.mxu1 %v672_v12  ;;  %v338_v24 = vunpack.c.0.s8 %v337_v18  ;;  %v686_v29 = vld [vmem:[#allocation3 + $0xc4] ss:$16 sps:$4 sm:$0xff]   ;;  %v694_v32 = vld [vmem:[#allocation3 + $0xa8] ss:$16 sps:$4 sm:$0xff]   ;;  %v689_v34 = vld [vmem:[#allocation3 + $0xc0] ss:$16 sps:$4 sm:$0xff]  }
  0x1e   :  { %v58_v31 = vld [vmem:[%s990_s4] sm:$0xff]  ;;  %v696_v35 = vld [vmem:[#allocation3 + $0xcc] ss:$16 sps:$4 sm:$0xff]   ;;  %v698_v40 = vld [vmem:[#allocation3 + $0xc8] ss:$16 sps:$4 sm:$0xff]   ;;  %v455_v57 = vsub.s32 0, %v904_v25 }
  0x1f   :  { %v341_v30 = vsub.s32 %v338_v24, %v904_v25  ;;  %v913_v33 = vld [vmem:[%s989_s3] sm:$0xff]  ;;  %v335_v38 = vcombine.high %v58_v31, %v58_v31  ;;  %v699_v43 = vld [vmem:[#allocation3 + $0xec] ss:$16 sps:$4 sm:$0xff]   ;;  %v701_v47 = vld [vmem:[#allocation3 + $0xe8] ss:$16 sps:$4 sm:$0xff]   ;;  %v459_v60 = vsub.s32 1, %v904_v25 }
  0x20   :  { %257 = vmatpush1.bf16.msra.mxu0 %v665_v9  ;;  %298 = vmatpush1.bf16.msra.mxu1 %v676_v14  ;;  %v692_v36 = vld [vmem:[#allocation3 + $0xe4] ss:$16 sps:$4 sm:$0xff]   ;;  %v643_v39 = vround.rtne.f32 %v913_v33  ;;  %v695_v41 = vld [vmem:[#allocation3 + $0xe0] ss:$16 sps:$4 sm:$0xff]   ;;  %v463_v7 = vsub.s32 2, %v904_v25  ;;  %s825_s21 = smov [#allocation6]  }
  0x21   :  { %258 = vmatprep.subr.bf16.mxu0 %v668_v10  ;;  %299 = vmatprep.subr.bf16.mxu1 %v678_v15  ;;  %v342_v37 = vrot.slane %v58_v31, %v341_v30  ;;  %v54_v42 = vld [vmem:[%s987_s1] sm:$0xff]  ;;  %v349_v45 = vrot.slane %v335_v38, %v341_v30  ;;  %s565_s22 = sshll.u32 %s825_s21, 4  ;;  %s566_s22 = int_to_ptr.vmem [resolvable:$true] %s565_s22 }
  0x22   :  { %504 = vperm.xlu0 %652, %v643_v39   ;;  %v59_v46 = vpack.c.bf16 %v54_v42, %v54_v42  ;;  %v53_v50 = vld [vmem:[%s986_s0] sm:$0xff] }
  0x23   :  { %v350_v44 = vcombine.high %v342_v37, %v342_v37  ;;  %v358_v48 = vsel %vm356_vm0, %v342_v37, 0  ;;  %v351_v49 = vcombine.high %v349_v45, %v349_v45  ;;  %v364_v51 = vsel %vm356_vm0, %v349_v45, 0  ;;  %v451_v59 = vld [vmem:[%s992_s6] sm:$0xf] }
  0x24   :  { %259 = vmatpush1.bf16.msra.mxu0 %v671_v13  ;;  %300 = vmatpush1.bf16.msra.mxu1 %v682_v20  ;;  %v57_v52 = vpack.c.bf16 %v53_v50, %v53_v50  ;;  %v460_v2 = vrot.slane %v451_v59, %v459_v60  ;;  %v464_v18 = vrot.slane %v451_v59, %v463_v7  ;;  %v640_v42 = vld [vmem:[%s993_s7] ss:$0 sm:$0xff]  ;;  %s824_s7 = smov [#allocation7]  }
  0x25   :  { %260 = vmatprep.subr.bf16.mxu0 %v674_v16  ;;  %301 = vmatprep.subr.bf16.mxu1 %v684_v22 }
  0x28   :  { %261 = vmatpush1.bf16.msra.mxu0 %v677_v21  ;;  %302 = vmatpush1.bf16.msra.mxu1 %v688_v26  ;;  %v467_v21 = vsub.s32 3, %v904_v25 }
  0x29   :  { %262 = vmatprep.subr.bf16.mxu0 %v680_v23  ;;  %303 = vmatprep.subr.bf16.mxu1 %v690_v28 }
  0x2a   :  { %v468_v23 = vrot.slane %v451_v59, %v467_v21 }
  0x2c   :  { %263 = vmatpush1.bf16.msra.mxu0 %v683_v27  ;;  %304 = vmatpush1.bf16.msra.mxu1 %v694_v32  ;;  %v55_v32 = vld [vmem:[%s988_s2] sm:$0xff] }
  0x2d   :  { %264 = vmatprep.subr.bf16.mxu0 %v686_v29  ;;  %305 = vmatprep.subr.bf16.mxu1 %v696_v35 }
  0x30   :  { %265 = vmatpush1.bf16.msra.mxu0 %v689_v34  ;;  %306 = vmatpush1.bf16.msra.mxu1 %v698_v40 }
  0x31   :  { %266 = vmatprep.subr.bf16.mxu0 %v692_v36  ;;  %307 = vmatprep.subr.bf16.mxu1 %v699_v43 }
  0x34   :  { %267 = vmatpush1.bf16.msra.mxu0 %v695_v41  ;;  %308 = vmatpush1.bf16.msra.mxu1 %v701_v47 }
  0x35   :  { %633 = vmatprep.subr.msk.bf16.mxu0 %vm356_vm0, %v350_v44  ;;  %635 = vmatprep.subr.msk.bf16.mxu1 %vm356_vm0, %v351_v49  ;;  %v520_v49 = vstv %s994_s8  ;;  %s575_s8 = sshll.u32 %s824_s7, 4  ;;  %s576_s8 = int_to_ptr.vmem [resolvable:$true] %s575_s8 }
  0x36   :  { %s747_s23 = scalar_lea.vmem %s576_s8, 128  ;;  %p752_p9 = scmp.lt.s32.totalorder %s576_s8, %s576_s8 }
  0x37   :  { %285 = vmatmul.mubr.bf16.vlgmr.msra.gmra.mrb[0].mxu0 %v59_v46  ;;  %326 = vmatmul.mubr.bf16.vlgmr.msra.gmra.mrb[0].mxu1 %v59_v46  ;;  %p748_p8 = scmp.ne.s32.totalorder %s576_s8, %s747_s23  ;;  %p753_p10 = scmp.lt.s32.totalorder %s747_s23, %s747_s23 }
  0x38   :  { %370 = vmatpush1.bf16.msra.mxu0 %v358_v48  ;;  %401 = vmatprep.mubr.bf16.mxu0 %v822_v0 }
  0x39   :  { %411 = vmatpush1.bf16.msra.mxu1 %v364_v51  ;;  %442 = vmatprep.mubr.bf16.mxu1 %v822_v0  ;;  %v456_v0 = vrot.slane %v451_v59, %v455_v57  ;;  %p754_p11 = por %p753_p10, %p752_p9 }
  0x3b   :  { %p755_p12 = pnand %p754_p11, %p748_p8 }
  0x3f   :  { %634 = vmatmul.mubr.msk.bf16.vlgmr.msra.gmra.mrb[4].mxu0 %vm352_vm1, %v57_v52  ;;  %636 = vmatmul.mubr.msk.bf16.vlgmr.msra.gmra.mrb[4].mxu1 %vm352_vm1, %v57_v52 }
  0xa1   :  { %v936_v40 = vpop.permute.xlu0 %504 }
 0x10a   :  { %v286_v53 = vpop.f32.mrb[0].mxu0  ;;  %v327_v58 = vpop.f32.mrb[0].mxu1 }
 0x10b   :  { %v288_v54 = vpop.f32.mrb[1].mxu0  ;;  %v329_v61 = vpop.f32.mrb[1].mxu1 }
 0x10c   :  { %v290_v55 = vpop.f32.mrb[2].mxu0  ;;  %v331_v62 = vpop.f32.mrb[2].mxu1 }
 0x10d   :  { %v291_v56 = vpop.f32.mrb[3].mxu0  ;;  %v332_v63 = vpop.f32.mrb[3].mxu1 }
 0x112   :  { %v403_v1 = vpop.f32.mrb[4].mxu0  ;;  %v444_v10 = vpop.f32.mrb[4].mxu1 }
 0x113   :  { %v404_v3 = vadd.f32 %v403_v1, %v286_v53  ;;  %v405_v4 = vpop.f32.mrb[5].mxu0  ;;  %v445_v12 = vadd.f32 %v444_v10, %v327_v58  ;;  %v446_v13 = vpop.f32.mrb[5].mxu1 }
 0x114   :  { %v406_v5 = vadd.f32 %v405_v4, %v288_v54  ;;  %v407_v6 = vpop.f32.mrb[6].mxu0  ;;  %v447_v15 = vadd.f32 %v446_v13, %v329_v61  ;;  %v448_v16 = vpop.f32.mrb[6].mxu1 }
 0x115   :  { %v473_v8 = vadd.f32 %v456_v0, %v404_v3  ;;  %v408_v9 = vpop.f32.mrb[7].mxu0  ;;  %v449_v20 = vpop.f32.mrb[7].mxu1  ;;  %v475_v22 = vadd.f32 %v464_v18, %v445_v12 }
 0x116   :  { %v474_v11 = vadd.f32 %v460_v2, %v406_v5  ;;  %v476_v26 = vadd.f32 %v468_v23, %v447_v15 }
 0x117   :  { %v637_v14 = vmul.f32 -1.442695, %v473_v8  ;;  %v639_v24 = vmul.f32 -1.442695, %v475_v22 }
 0x118   :  { %v638_v17 = vmul.f32 -1.442695, %v474_v11 }
 0x119   :  { %703 = vpow2.f32 %v637_v14 }
 0x11a   :  { %705 = vpow2.f32 %v638_v17 }
 0x11b   :  { %707 = vpow2.f32 %v639_v24 }
 0x11c   :  { %709 = vtanh.f32 %v476_v26 }
 0x123   :  { %v704_v27 = vpop.eup %703 }
 0x124   :  { %v706_v28 = vpop.eup %705  ;;  %v480_v29 = vadd.f32 1.0, %v704_v27 }
 0x125   :  { %v486_v30 = vadd.f32 1.0, %v706_v28  ;;  %v708_v31 = vpop.eup %707 }
 0x126   :  { %711 = vrcp.f32 %v480_v29  ;;  %v710_v34 = vpop.eup %709  ;;  %v492_v37 = vadd.f32 1.0, %v708_v31 }
 0x127   :  { %713 = vrcp.f32 %v486_v30 }
 0x128   :  { %715 = vrcp.f32 %v492_v37 }
 0x130   :  { %v712_v25 = vpop.eup %711 }
 0x131   :  { %v714_v35 = vpop.eup %713  ;;  %v496_v36 = vmul.f32 %v712_v25, %v55_v32 }
 0x132   :  { %v497_v38 = vmul.f32 %v714_v35, %v710_v34  ;;  %v716_v45 = vpop.eup %715 }
 0x134   :  { %v498_v41 = vadd.f32 %v497_v38, %v496_v36 }
 0x136   :  { %717 = vtanh.f32 %v498_v41  ;;  %v508_v43 = vmul.f32 %v936_v40, %v498_v41 }
 0x138   :  { %v516_v44 = vmul.f32 %v640_v42, %v508_v43  ;;  %537 = vst [vmem:[#allocation7] sm:$0xff] %v508_v43 }
 0x13a   :  { %517 = vadd.xlane.f32.xlu0 %v516_v44 }
 0x140   :  { %v718_v46 = vpop.eup %717 }
 0x141   :  { %v500_v47 = vmul.f32 %v718_v46, %v716_v45 }
 0x143   :  { %v507_v48 = vmul.f32 %v936_v40, %v500_v47 }
 0x145   :  { %536 = vst [vmem:[#allocation6] sm:$0xff] %v507_v48 }
 0x1c7   :  { %v518_v50 = vpop.xlane.xlu0 %517 }
 0x1c8   :  { %v521_v51 = vadd.f32 %v520_v49, %v518_v50 }
 0x1ca   :  { %v641_v52 = vmul.f32 -1.442695, %v521_v51 }
 0x1cc   :  { %719 = vpow2.f32 %v641_v52 }
 0x1d6   :  { %v720_v53 = vpop.eup %719 }
 0x1d7   :  { %v525_v54 = vadd.f32 1.0, %v720_v53 }
 0x1d9   :  { %721 = vrcp.f32 %v525_v54 }
 0x1e3   :  { %v722_v55 = vpop.eup %721 }
 0x1e4   :  { %v528_v56 = vmul.f32 %v722_v55, %v643_v39 }
 0x1e6   :  { %vm529_vm2 = vcmp.ne.f32.partialorder %v528_v56, 0.0 }
 0x1e7   :  { %v530_v57 = vsel %vm529_vm2, %v528_v56, 1.0 }
 0x1e8   :  { %723 = vrcp.f32 %v530_v57 }
 0x1f2   :  { %v724_v58 = vpop.eup %723 }
 0x1f3   :  { %v532_v59 = vmul.f32 0.5, %v724_v58 }
 0x1f5   :  { %v533_v60 = vceil.f32 %v532_v59 }
 0x1f7   :  { %v642_v61 = vadd.f32 -1.0, %v533_v60 }
 0x1f9   :  { %v535_v62 = vsel %vm529_vm2, %v642_v61, inf }
 0x1fa   :  { %546 = vperm.xlu1 %653, %v535_v62  }
 0x1fe   :  { %553 = vperm.xlu1 %653, %v528_v56  }
 0x1ff   :  { %758 = shalt.err (!%p755_p12)
}
 0x200   :  { %s759_s26 = scalar_lea.hbm %s996_s10, 128 }
 0x201   :  { %p760_p13 = scmp.ne.s32.totalorder %s996_s10, %s759_s26  ;;  %p763_p0 = scmp.lt.u32.totalorder %s759_s26, %s996_s10 }
 0x203   :  { %p765_p1 = pnand %p763_p0, %p760_p13 }
 0x205   :  { %768 = shalt.err (!%p765_p1)
}
 0x206   :  { %578 = dma.vmem_to_hbm [thread:$0]  %s576_s8, 128, %s996_s10, [#allocation8]  }
 0x207   :  { %s769_s13 = scalar_lea.vmem %s566_s22, 128  ;;  %p774_p3 = scmp.lt.s32.totalorder %s566_s22, %s566_s22 }
 0x208   :  { %p770_p2 = scmp.ne.s32.totalorder %s566_s22, %s769_s13  ;;  %p775_p4 = scmp.lt.s32.totalorder %s769_s13, %s769_s13 }
 0x20a   :  { %p776_p5 = por %p775_p4, %p774_p3 }
 0x20c   :  { %p777_p6 = pnand %p776_p5, %p770_p2 }
 0x20e   :  { %780 = shalt.err (!%p777_p6)
}
 0x20f   :  { %s781_s4 = scalar_lea.hbm %s995_s9, 128 }
 0x210   :  { %p782_p7 = scmp.ne.s32.totalorder %s995_s9, %s781_s4  ;;  %p785_p8 = scmp.lt.u32.totalorder %s781_s4, %s995_s9 }
 0x212   :  { %p787_p9 = pnand %p785_p8, %p782_p7 }
 0x214   :  { %790 = shalt.err (!%p787_p9)
}
 0x215   :  { %568 = dma.vmem_to_hbm [thread:$0]  %s566_s22, 128, %s995_s9, [#allocation5]   ;;  %v539_v33 = vand.u32 127, %v339_v19 }
 0x216   :  { %s826_s6 = smov [#allocation9]  }
 0x217   :  { %vm543_vm3 = vcmp.eq.s32.totalorder %v539_v33, 3  ;;  %vm542_vm4 = vcmp.eq.s32.totalorder %v539_v33, 2  ;;  %vm541_vm5 = vcmp.eq.s32.totalorder %v539_v33, 1  ;;  %s585_s18 = sshll.u32 %s826_s6, 4  ;;  %vm540_vm6 = vcmp.eq.s32.totalorder %v539_v33, 0  ;;  %s586_s18 = int_to_ptr.vmem [resolvable:$true] %s585_s18 }
 0x218   :  { %s791_s19 = scalar_lea.vmem %s586_s18, 128  ;;  %p796_p11 = scmp.lt.s32.totalorder %s586_s18, %s586_s18 }
 0x219   :  { %p792_p10 = scmp.ne.s32.totalorder %s586_s18, %s791_s19  ;;  %p797_p12 = scmp.lt.s32.totalorder %s791_s19, %s791_s19 }
 0x21b   :  { %p798_p13 = por %p797_p12, %p796_p11 }
 0x21d   :  { %p799_p0 = pnand %p798_p13, %p792_p10 }
 0x279   :  { %v547_v39 = vpop.permute.xlu1 %546 }
 0x27a   :  { %v549_v63 = vsel %vm543_vm3, %v547_v39, 0.0 }
 0x27b   :  { %v550_v0 = vsel %vm542_vm4, %v722_v55, %v549_v63 }
 0x27d   :  { %v554_v1 = vpop.permute.xlu1 %553 }
 0x27e   :  { %v556_v2 = vsel %vm541_vm5, %v554_v1, %v550_v0 }
 0x27f   :  { %v557_v3 = vsel %vm540_vm6, %v936_v40, %v556_v2 }
 0x280   :  { %558 = vst [vmem:[#allocation9] sm:$0xff] %v557_v3 }
 0x281   :  { %802 = shalt.err (!%p799_p0)
}
 0x282   :  { %s803_s20 = scalar_lea.hbm %s997_s11, 128 }
 0x283   :  { %p804_p1 = scmp.ne.s32.totalorder %s997_s11, %s803_s20  ;;  %p807_p2 = scmp.lt.u32.totalorder %s803_s20, %s997_s11 }
 0x285   :  { %p809_p3 = pnand %p807_p2, %p804_p1 }
 0x287   :  { %812 = shalt.err (!%p809_p3)
}
 0x288   :  { %588 = dma.vmem_to_hbm [thread:$0]  %s586_s18, 128, %s997_s11, [#allocation8]  }
 0x289   :  { %815 = dma.done.wait [#allocation5], 128  }
 0x28a   :  { %816 = vsyncadd [#allocation5], 4294967168 }
 0x28b   :  { %817 = dma.done.wait [#allocation8], 256  }
 0x28c   :  { %818 = vsyncadd [#allocation8], 4294967040 }
 0x28d   :  { %598 = vsyncpa [#allocation4], 1 }
 0x28e   :  { %599 = vsyncpa [#allocation5], 1 }
 0x28f   :  { %600 = vsyncpa [#allocation8], 1 }

</bundles_post_ra>
